<compile_context>
chip_gen: v6e
topology: v6e:2x2x1
jax: 0.10.0
libtpu: 0.0.40
codegen_flags: <defaults>
</compile_context>

<pallas_src>
import functools

import jax
import jax.numpy as jnp
from jax.experimental import pallas as pl
from jax.experimental.pallas import tpu as pltpu

GAMMA = 2.0
ALPHA = 0.25
EPS = 1e-07

_LANE_W = 1024        # wide lane-dense slab: unmasked wide vst, fewer grid steps
_SUBLANES = 8
_MAX_TILE_ROWS = 256  # (256, 1024) f32 = 1 MiB per block


def _int_pow(x, g: int):
    """x**g for non-negative integer g via multiplication only (VPU, no EUP)."""
    if g == 0:
        return jnp.ones_like(x)
    result = None
    base = x
    while g > 0:
        if g & 1:
            result = base if result is None else result * base
        g >>= 1
        if g:
            base = base * base
    return result


def _focal_kernel(pr_ref, gt_ref, o_ref, *, gamma, alpha, eps):
    # Load in native dtype, compute in f32, store in the output's dtype.
    pr = pr_ref[...].astype(jnp.float32)
    gt = gt_ref[...].astype(jnp.float32)

    pr = jnp.clip(pr, eps, 1.0 - eps)
    one_minus_pr = 1.0 - pr

    g = float(gamma)
    if g.is_integer() and g >= 0:
        # VALU multiplies only (gamma=2 -> x*x); keeps the EUP slot for the logs.
        pow_omp = _int_pow(one_minus_pr, int(g))
        pow_pr = _int_pow(pr, int(g))
    else:
        # Non-integer gamma: fall back to pow (exp/log on EUP).
        pow_omp = jnp.power(one_minus_pr, gamma)
        pow_pr = jnp.power(pr, gamma)

    loss_1 = -gt * (alpha * pow_omp) * jnp.log(pr)
    loss_0 = -(1.0 - gt) * ((1.0 - alpha) * pow_pr) * jnp.log(one_minus_pr)
    o_ref[...] = (loss_0 + loss_1).astype(o_ref.dtype)


def binary_focal_loss(pr, gt, gamma=GAMMA, alpha=ALPHA, eps=EPS):
    """Elementwise binary focal loss; returns an array with pr's shape/dtype."""
    assert pr.shape == gt.shape, "pr and gt must have the same shape"
    orig_shape = pr.shape
    out_dtype = pr.dtype

    n = pr.size
    rows = pl.cdiv(n, _LANE_W)
    rows_pad = pl.cdiv(rows, _SUBLANES) * _SUBLANES
    padded_n = rows_pad * _LANE_W

    def to_slab(x, pad_value):
        # Single pad directly to the final slab size; skipped when not needed.
        # Padded region is sliced away after the kernel (pr pads with 0.5 to
        # stay in log's domain; gt pads with 0.0 to be reduction-safe).
        x = jnp.ravel(x)
        if padded_n != n:
            x = jnp.pad(x, (0, padded_n - n), constant_values=pad_value)
        return x.reshape(rows_pad, _LANE_W)

    pr2d = to_slab(pr, 0.5)
    gt2d = to_slab(gt, 0.0)

    # Largest multiple of 8 <= _MAX_TILE_ROWS that divides rows_pad.
    tile_rows = min(rows_pad, _MAX_TILE_ROWS)
    while rows_pad % tile_rows != 0:
        tile_rows -= _SUBLANES
    # Keep >= 2 grid steps when possible so v7x's two TensorCores both work.
    if (rows_pad // tile_rows < 2
            and rows_pad >= 2 * _SUBLANES
            and (rows_pad // 2) % _SUBLANES == 0):
        tile_rows = rows_pad // 2

    grid = (rows_pad // tile_rows,)
    block = pl.BlockSpec((tile_rows, _LANE_W), lambda i: (i, 0))

    kernel = functools.partial(_focal_kernel, gamma=gamma, alpha=alpha, eps=eps)

    out2d = pl.pallas_call(
        kernel,
        out_shape=jax.ShapeDtypeStruct((rows_pad, _LANE_W), out_dtype),
        grid_spec=pltpu.PrefetchScalarGridSpec(
            num_scalar_prefetch=0,
            grid=grid,
            in_specs=[block, block],
            out_specs=block,
        ),
        compiler_params=pltpu.CompilerParams(
            dimension_semantics=("parallel",),
            # 2 inputs + 1 output, double-buffered, 1 MiB f32 blocks -> ~6 MiB;
            # explicit budget keeps v7x's smaller VMEM safe if tiles are retuned.
            vmem_limit_bytes=32 * 1024 * 1024,
        ),
    )(pr2d, gt2d)

    if padded_n != n:
        return out2d.reshape(padded_n)[:n].reshape(orig_shape)
    return out2d.reshape(orig_shape)


def _reference(pr, gt, gamma=GAMMA, alpha=ALPHA, eps=EPS):
    pr = jnp.clip(pr, eps, 1.0 - eps)
    loss_1 = -gt * (alpha * jnp.power(1.0 - pr, gamma)) * jnp.log(pr)
    loss_0 = -(1.0 - gt) * ((1.0 - alpha) * jnp.power(pr, gamma)) * jnp.log(1.0 - pr)
    return loss_0 + loss_1


if __name__ == "__main__":
    key = jax.random.PRNGKey(0)
    k1, k2 = jax.random.split(key)
    # NCHW, as the segmentation model would hand to the loss.
    shape = (2, 4, 16, 16)
    pr = jax.random.uniform(k1, shape, dtype=jnp.float32)            # predictions in (0, 1)
    gt = (jax.random.uniform(k2, shape, dtype=jnp.float32) > 0.5).astype(jnp.float32)  # binary targets

    loss = jax.block_until_ready(binary_focal_loss(pr, gt))
    ref = _reference(pr, gt)

    assert loss.shape == shape
    assert loss.dtype == pr.dtype
    assert jnp.allclose(loss, ref, atol=1e-5, rtol=1e-5), "mismatch vs reference"
    print("KERNEL_OK")
</pallas_src>

<mosaic_0001>
module attributes {stable_mosaic.version = 11 : i64} {
  func.func @_focal_kernel(%arg0: i32, %arg1: memref<8x1024xf32, #tpu.memory_space<vmem>>, %arg2: memref<8x1024xf32, #tpu.memory_space<vmem>>, %arg3: memref<8x1024xf32, #tpu.memory_space<vmem>>) attributes {dimension_semantics = [#tpu.dimension_semantics<parallel>], iteration_bounds = array<i64: 1>, scalar_prefetch = 0 : i64, scratch_operands = 0 : i64, tpu.core_type = #tpu.core_type<tc>, window_params = [{transform_indices = @transform_0, window_bounds = array<i64: 8, 1024>}, {transform_indices = @transform_1, window_bounds = array<i64: 8, 1024>}, {transform_indices = @transform_2, window_bounds = array<i64: 8, 1024>}]} {
    %c0 = arith.constant 0 : index
    %c0_0 = arith.constant 0 : index
    %0 = vector.load %arg1[%c0, %c0_0] : memref<8x1024xf32, #tpu.memory_space<vmem>>, vector<8x1024xf32>
    %c0_1 = arith.constant 0 : index
    %c0_2 = arith.constant 0 : index
    %1 = vector.load %arg2[%c0_1, %c0_2] : memref<8x1024xf32, #tpu.memory_space<vmem>>, vector<8x1024xf32>
    %cst = arith.constant 1.000000e-07 : f32
    %cst_3 = arith.constant 0.99999988 : f32
    %2 = vector.broadcast %cst : f32 to vector<8x1024xf32>
    %3 = arith.maximumf %2, %0 : vector<8x1024xf32>
    %4 = vector.broadcast %cst_3 : f32 to vector<8x1024xf32>
    %5 = arith.minimumf %4, %3 : vector<8x1024xf32>
    %cst_4 = arith.constant 1.000000e+00 : f32
    %6 = vector.broadcast %cst_4 : f32 to vector<8x1024xf32>
    %7 = arith.subf %6, %5 : vector<8x1024xf32>
    %8 = arith.mulf %7, %7 : vector<8x1024xf32>
    %9 = arith.mulf %5, %5 : vector<8x1024xf32>
    %cst_5 = arith.constant 0.000000e+00 : f32
    %10 = vector.broadcast %cst_5 : f32 to vector<8x1024xf32>
    %11 = arith.subf %10, %1 : vector<8x1024xf32>
    %cst_6 = arith.constant 2.500000e-01 : f32
    %12 = vector.broadcast %cst_6 : f32 to vector<8x1024xf32>
    %13 = arith.mulf %12, %8 : vector<8x1024xf32>
    %14 = arith.mulf %11, %13 : vector<8x1024xf32>
    %15 = math.log %5 : vector<8x1024xf32>
    %16 = arith.mulf %14, %15 : vector<8x1024xf32>
    %cst_7 = arith.constant 1.000000e+00 : f32
    %17 = vector.broadcast %cst_7 : f32 to vector<8x1024xf32>
    %18 = arith.subf %17, %1 : vector<8x1024xf32>
    %cst_8 = arith.constant 0.000000e+00 : f32
    %19 = vector.broadcast %cst_8 : f32 to vector<8x1024xf32>
    %20 = arith.subf %19, %18 : vector<8x1024xf32>
    %cst_9 = arith.constant 7.500000e-01 : f32
    %21 = vector.broadcast %cst_9 : f32 to vector<8x1024xf32>
    %22 = arith.mulf %21, %9 : vector<8x1024xf32>
    %23 = arith.mulf %20, %22 : vector<8x1024xf32>
    %24 = math.log %7 : vector<8x1024xf32>
    %25 = arith.mulf %23, %24 : vector<8x1024xf32>
    %26 = arith.addf %25, %16 : vector<8x1024xf32>
    %c0_10 = arith.constant 0 : index
    %c0_11 = arith.constant 0 : index
    %27 = vector.load %arg3[%c0_10, %c0_11] : memref<8x1024xf32, #tpu.memory_space<vmem>>, vector<8x1024xf32>
    tpu.vector_store %arg3[%c0_10, %c0_11], %26 {strides = array<i32>} : memref<8x1024xf32, #tpu.memory_space<vmem>>, vector<8x1024xf32>,
    return
  }
  func.func @transform_0(%arg0: i32) -> (i32, i32) {
    %c0_i32 = arith.constant 0 : i32
    %c0_i32_0 = arith.constant 0 : i32
    return %arg0, %c0_i32 : i32, i32
  }
  func.func @transform_1(%arg0: i32) -> (i32, i32) {
    %c0_i32 = arith.constant 0 : i32
    %c0_i32_0 = arith.constant 0 : i32
    return %arg0, %c0_i32 : i32, i32
  }
  func.func @transform_2(%arg0: i32) -> (i32, i32) {
    %c0_i32 = arith.constant 0 : i32
    %c0_i32_0 = arith.constant 0 : i32
    return %arg0, %c0_i32 : i32, i32
  }
}

</mosaic_0001>

<bundles_post_ra>
// kernel: tpu_custom_call.1
= control target key start
LH: loop header
LB: loop body
LE: loop exit
PB: predicated region body
PF: predicated region fallthrough
CT: control target
= control target key end

     0   :  { %7 = vsyncpa [#allocation3], 0  ;;  %s364_s0 = inlined_call_operand.hbm [shape: f32[8,1024], index: 0, kind: input, shape index: {}]   ;;  %s365_s1 = inlined_call_operand.hbm [shape: f32[8,1024], index: 1, kind: input, shape index: {}]   ;;  %s366_s2 = inlined_call_operand.hbm [shape: f32[8,1024], index: 2, kind: output, shape index: {}]  }
   0x1   :  { %8 = vsyncpa [#allocation6], 0 }
   0x2   :  { %9 = vsyncpa [#allocation4], 0  ;;  %s329_s9 = smov [#allocation2]   ;;  %s330_s11 = smov [#allocation5]  }
   0x3   :  { %s16_s10 = sshll.u32 %s329_s9, 4  ;;  %s26_s12 = sshll.u32 %s330_s11, 4  ;;  %s17_s10 = int_to_ptr.vmem [resolvable:$true] %s16_s10  ;;  %s27_s12 = int_to_ptr.vmem [resolvable:$true] %s26_s12 }
   0x4   :  { %s271_s13 = scalar_lea.vmem %s17_s10, 1024  ;;  %p276_p1 = scmp.lt.s32.totalorder %s17_s10, %s17_s10 }
   0x5   :  { %p272_p0 = scmp.ne.s32.totalorder %s17_s10, %s271_s13  ;;  %p277_p2 = scmp.lt.s32.totalorder %s271_s13, %s271_s13 }
   0x7   :  { %p278_p3 = por %p277_p2, %p276_p1 }
   0x9   :  { %p279_p4 = pnand %p278_p3, %p272_p0 }
   0xb   :  { %282 = shalt.err (!%p279_p4)
}
   0xc   :  { %19 = dma.hbm_to_vmem [thread:$0]  %s364_s0, 1024, %s17_s10, [#allocation3]  }
   0xd   :  { %s291_s16 = scalar_lea.vmem %s27_s12, 1024  ;;  %p296_p6 = scmp.lt.s32.totalorder %s27_s12, %s27_s12 }
   0xe   :  { %p292_p5 = scmp.ne.s32.totalorder %s27_s12, %s291_s16  ;;  %p297_p7 = scmp.lt.s32.totalorder %s291_s16, %s291_s16 }
  0x10   :  { %p298_p8 = por %p297_p7, %p296_p6 }
  0x12   :  { %p299_p9 = pnand %p298_p8, %p292_p5 }
  0x14   :  { %302 = shalt.err (!%p299_p9)
}
  0x15   :  { %29 = dma.hbm_to_vmem [thread:$0]  %s365_s1, 1024, %s27_s12, [#allocation6]  }
  0x16   :  { %323 = dma.done.wait [#allocation3], 1024  }
  0x17   :  { %324 = vsyncadd [#allocation3], 4294966272 }
  0x18   :  { %325 = dma.done.wait [#allocation6], 1024  }
  0x19   :  { %326 = vsyncadd [#allocation6], 4294966272  ;;  %v36_v0 = vld [vmem:[#allocation2] sm:$0xff]  ;;  %v37_v1 = vld [vmem:[#allocation2 + $0x8] sm:$0xff]  ;;  %s331_s0 = smov [#allocation7]  }
  0x1a   :  { %v52_v2 = vmax.f32 %v36_v0, 1e-07  ;;  %v38_v3 = vld [vmem:[#allocation2 + $0x10] sm:$0xff]  ;;  %v53_v4 = vmax.f32 %v37_v1, 1e-07  ;;  %v44_v7 = vld [vmem:[#allocation5] sm:$0xff] }
  0x1b   :  { %v54_v6 = vmax.f32 %v38_v3, 1e-07  ;;  %v45_v10 = vld [vmem:[#allocation5 + $0x8] sm:$0xff]  ;;  %v46_v13 = vld [vmem:[#allocation5 + $0x10] sm:$0xff]  ;;  %v140_v15 = vsub.f32 1.0, %v44_v7  ;;  %v39_v19 = vld [vmem:[#allocation2 + $0x18] sm:$0xff] }
  0x1c   :  { %v60_v5 = vmin.f32 %v52_v2, 0.9999999  ;;  %v61_v8 = vmin.f32 %v53_v4, 0.9999999  ;;  %v141_v18 = vsub.f32 1.0, %v45_v10  ;;  %v142_v21 = vsub.f32 1.0, %v46_v13 }
  0x1d   :  { %v62_v11 = vmin.f32 %v54_v6, 0.9999999  ;;  %v40_v22 = vld [vmem:[#allocation2 + $0x20] sm:$0xff]  ;;  %v92_v23 = vsub.f32 0.0, %v44_v7  ;;  %v148_v26 = vsub.f32 0.0, %v140_v15  ;;  %v41_v30 = vld [vmem:[#allocation2 + $0x28] sm:$0xff] }
  0x1e   :  { %v68_v9 = vsub.f32 1.0, %v60_v5  ;;  %231 = vlog2.f32 %v60_v5  ;;  %v69_v12 = vsub.f32 1.0, %v61_v8  ;;  %v84_v14 = vmul.f32 %v60_v5, %v60_v5  ;;  %v353_v38 = vld [vmem:[#allocation5 + $0x18] sm:$0xff]  ;;  %v355_v47 = vld [vmem:[#allocation5 + $0x20] sm:$0xff]  ;;  %s218_s1 = sshll.u32 %s331_s0, 4  ;;  %s219_s1 = int_to_ptr.vmem [resolvable:$true] %s218_s1 }
  0x1f   :  { %233 = vlog2.f32 %v61_v8  ;;  %v70_v16 = vsub.f32 1.0, %v62_v11  ;;  %v85_v17 = vmul.f32 %v61_v8, %v61_v8  ;;  %v86_v25 = vmul.f32 %v62_v11, %v62_v11  ;;  %s303_s19 = scalar_lea.vmem %s219_s1, 1024  ;;  %p308_p11 = scmp.lt.s32.totalorder %s219_s1, %s219_s1 }
  0x20   :  { %235 = vlog2.f32 %v68_v9  ;;  %v76_v20 = vmul.f32 %v68_v9, %v68_v9  ;;  %v77_v24 = vmul.f32 %v69_v12, %v69_v12  ;;  %v156_v27 = vmul.f32 0.75, %v84_v14  ;;  %v42_v14 = vld [vmem:[#allocation2 + $0x30] sm:$0xff]  ;;  %p304_p10 = scmp.ne.s32.totalorder %s219_s1, %s303_s19  ;;  %p309_p12 = scmp.lt.s32.totalorder %s303_s19, %s303_s19 }
  0x21   :  { %237 = vlog2.f32 %v69_v12  ;;  %v78_v28 = vmul.f32 %v70_v16, %v70_v16  ;;  %v55_v29 = vmax.f32 %v39_v19, 1e-07  ;;  %v93_v31 = vsub.f32 0.0, %v45_v10 }
  0x22   :  { %239 = vlog2.f32 %v62_v11  ;;  %v149_v32 = vsub.f32 0.0, %v141_v18  ;;  %v157_v33 = vmul.f32 0.75, %v85_v17  ;;  %v56_v34 = vmax.f32 %v40_v22, 1e-07  ;;  %p310_p13 = por %p309_p12, %p308_p11 }
  0x23   :  { %241 = vlog2.f32 %v70_v16  ;;  %v100_v35 = vmul.f32 0.25, %v76_v20  ;;  %v94_v36 = vsub.f32 0.0, %v46_v13  ;;  %v150_v37 = vsub.f32 0.0, %v142_v21  ;;  %v49_v13 = vld [vmem:[#allocation5 + $0x28] sm:$0xff] }
  0x24   :  { %v63_v39 = vmin.f32 %v55_v29, 0.9999999  ;;  %v101_v40 = vmul.f32 0.25, %v77_v24  ;;  %v158_v41 = vmul.f32 0.75, %v86_v25  ;;  %v64_v42 = vmin.f32 %v56_v34, 0.9999999  ;;  %p311_p0 = pnand %p310_p13, %p304_p10 }
  0x25   :  { %v57_v43 = vmax.f32 %v41_v30, 1e-07  ;;  %v164_v44 = vmul.f32 %v156_v27, %v148_v26  ;;  %v102_v45 = vmul.f32 0.25, %v78_v28  ;;  %v165_v48 = vmul.f32 %v157_v33, %v149_v32 }
  0x26   :  { %v71_v46 = vsub.f32 1.0, %v63_v39  ;;  %243 = vlog2.f32 %v63_v39  ;;  %v72_v49 = vsub.f32 1.0, %v64_v42  ;;  %v108_v51 = vmul.f32 %v100_v35, %v92_v23  ;;  %v43_v23 = vld [vmem:[#allocation2 + $0x38] sm:$0xff] }
  0x27   :  { %245 = vlog2.f32 %v64_v42  ;;  %v65_v50 = vmin.f32 %v57_v43, 0.9999999  ;;  %v95_v52 = vsub.f32 0.0, %v353_v38  ;;  %v143_v53 = vsub.f32 1.0, %v353_v38 }
  0x28   :  { %247 = vlog2.f32 %v71_v46  ;;  %v109_v55 = vmul.f32 %v101_v40, %v93_v31  ;;  %v166_v56 = vmul.f32 %v158_v41, %v150_v37  ;;  %v144_v57 = vsub.f32 1.0, %v355_v47 }
  0x29   :  { %249 = vlog2.f32 %v72_v49  ;;  %v110_v60 = vmul.f32 %v102_v45, %v94_v36  ;;  %v79_v61 = vmul.f32 %v71_v46, %v71_v46  ;;  %v87_v62 = vmul.f32 %v63_v39, %v63_v39 }
  0x2a   :  { %v80_v1 = vmul.f32 %v72_v49, %v72_v49  ;;  %v96_v2 = vsub.f32 0.0, %v355_v47  ;;  %v73_v3 = vsub.f32 1.0, %v65_v50  ;;  %v151_v7 = vsub.f32 0.0, %v143_v53 }
  0x2b   :  { %v232_v54 = vpop.eup %231  ;;  %251 = vlog2.f32 %v65_v50  ;;  %v88_v11 = vmul.f32 %v64_v42, %v64_v42  ;;  %v152_v12 = vsub.f32 0.0, %v144_v57  ;;  %v103_v18 = vmul.f32 0.25, %v79_v61 }
  0x2c   :  { %v234_v58 = vpop.eup %233  ;;  %v117_v59 = vmul.f32 0.6931472, %v232_v54  ;;  %v159_v19 = vmul.f32 0.75, %v87_v62  ;;  %v104_v22 = vmul.f32 0.25, %v80_v1  ;;  %253 = vlog2.f32 %v73_v3 }
  0x2d   :  { %v236_v63 = vpop.eup %235  ;;  %v119_v0 = vmul.f32 0.6931472, %v234_v58  ;;  %v145_v26 = vsub.f32 1.0, %v49_v13  ;;  %v58_v27 = vmax.f32 %v42_v14, 1e-07  ;;  %v160_v30 = vmul.f32 0.75, %v88_v11 }
  0x2e   :  { %v238_v4 = vpop.eup %237  ;;  %v132_v5 = vmul.f32 %v117_v59, %v108_v51  ;;  %v173_v6 = vmul.f32 0.6931472, %v236_v63  ;;  %v81_v31 = vmul.f32 %v73_v3, %v73_v3  ;;  %v111_v32 = vmul.f32 %v103_v18, %v95_v52  ;;  %v50_v58 = vld [vmem:[#allocation5 + $0x30] sm:$0xff] }
  0x2f   :  { %v240_v8 = vpop.eup %239  ;;  %v133_v9 = vmul.f32 %v119_v0, %v109_v55  ;;  %v175_v10 = vmul.f32 0.6931472, %v238_v4  ;;  %v89_v33 = vmul.f32 %v65_v50, %v65_v50  ;;  %v66_v34 = vmin.f32 %v58_v27, 0.9999999 }
  0x30   :  { %v242_v15 = vpop.eup %241  ;;  %v188_v16 = vmul.f32 %v173_v6, %v164_v44  ;;  %v121_v17 = vmul.f32 0.6931472, %v240_v8  ;;  %v59_v35 = vmax.f32 %v43_v23, 1e-07  ;;  %v112_v38 = vmul.f32 %v104_v22, %v96_v2 }
  0x31   :  { %v189_v20 = vmul.f32 %v175_v10, %v165_v48  ;;  %v177_v21 = vmul.f32 0.6931472, %v242_v15  ;;  %v97_v39 = vsub.f32 0.0, %v49_v13  ;;  %v167_v42 = vmul.f32 %v159_v19, %v151_v7 }
  0x32   :  { %v196_v24 = vadd.f32 %v188_v16, %v132_v5  ;;  %v134_v25 = vmul.f32 %v121_v17, %v110_v60  ;;  %v74_v43 = vsub.f32 1.0, %v66_v34  ;;  %255 = vlog2.f32 %v66_v34  ;;  %v51_v5 = vld [vmem:[#allocation5 + $0x38] sm:$0xff] }
  0x33   :  { %v197_v28 = vadd.f32 %v189_v20, %v133_v9  ;;  %v190_v29 = vmul.f32 %v177_v21, %v166_v56  ;;  %v244_v36 = vpop.eup %243  ;;  %v168_v46 = vmul.f32 %v160_v30, %v152_v12  ;;  %v105_v47 = vmul.f32 0.25, %v81_v31 }
  0x34   :  { %204 = vst [vmem:[#allocation7] sm:$0xff] %v196_v24  ;;  %v246_v40 = vpop.eup %245  ;;  %v123_v41 = vmul.f32 0.6931472, %v244_v36  ;;  %v67_v48 = vmin.f32 %v59_v35, 0.9999999  ;;  %v153_v52 = vsub.f32 0.0, %v145_v26  ;;  %257 = vlog2.f32 %v74_v43 }
  0x35   :  { %205 = vst [vmem:[#allocation7 + $0x8] sm:$0xff] %v197_v28  ;;  %v198_v37 = vadd.f32 %v190_v29, %v134_v25  ;;  %v248_v44 = vpop.eup %247  ;;  %v125_v45 = vmul.f32 0.6931472, %v246_v40  ;;  %v161_v53 = vmul.f32 0.75, %v89_v33  ;;  %v113_v61 = vmul.f32 %v105_v47, %v97_v39 }
  0x36   :  { %v250_v49 = vpop.eup %249  ;;  %v135_v50 = vmul.f32 %v123_v41, %v111_v32  ;;  %v179_v51 = vmul.f32 0.6931472, %v248_v44  ;;  %v75_v56 = vsub.f32 1.0, %v67_v48  ;;  %v82_v62 = vmul.f32 %v74_v43, %v74_v43 }
  0x37   :  { %206 = vst [vmem:[#allocation7 + $0x10] sm:$0xff] %v198_v37  ;;  %v136_v54 = vmul.f32 %v125_v45, %v112_v38  ;;  %v181_v55 = vmul.f32 0.6931472, %v250_v49  ;;  %259 = vlog2.f32 %v67_v48  ;;  %v169_v1 = vmul.f32 %v161_v53, %v153_v52 }
  0x38   :  { %v191_v57 = vmul.f32 %v179_v51, %v167_v42  ;;  %v252_v59 = vpop.eup %251  ;;  %v90_v3 = vmul.f32 %v66_v34, %v66_v34  ;;  %v146_v4 = vsub.f32 1.0, %v50_v58  ;;  %261 = vlog2.f32 %v75_v56 }
  0x39   :  { %v192_v60 = vmul.f32 %v181_v55, %v168_v46  ;;  %v127_v0 = vmul.f32 0.6931472, %v252_v59  ;;  %v254_v6 = vpop.eup %253  ;;  %v98_v7 = vsub.f32 0.0, %v50_v58  ;;  %v106_v10 = vmul.f32 0.25, %v82_v62 }
  0x3a   :  { %v199_v63 = vadd.f32 %v191_v57, %v135_v50  ;;  %v183_v9 = vmul.f32 0.6931472, %v254_v6  ;;  %v83_v11 = vmul.f32 %v75_v56, %v75_v56  ;;  %v147_v12 = vsub.f32 1.0, %v51_v5 }
  0x3b   :  { %v200_v2 = vadd.f32 %v192_v60, %v136_v54  ;;  %v137_v8 = vmul.f32 %v127_v0, %v113_v61  ;;  %v154_v14 = vsub.f32 0.0, %v146_v4  ;;  %v162_v15 = vmul.f32 0.75, %v90_v3 }
  0x3c   :  { %207 = vst [vmem:[#allocation7 + $0x18] sm:$0xff] %v199_v63  ;;  %v193_v13 = vmul.f32 %v183_v9, %v169_v1  ;;  %v91_v16 = vmul.f32 %v67_v48, %v67_v48  ;;  %v114_v19 = vmul.f32 %v106_v10, %v98_v7  ;;  %v99_v20 = vsub.f32 0.0, %v51_v5 }
  0x3d   :  { %208 = vst [vmem:[#allocation7 + $0x20] sm:$0xff] %v200_v2  ;;  %v107_v21 = vmul.f32 0.25, %v83_v11  ;;  %v170_v23 = vmul.f32 %v162_v15, %v154_v14  ;;  %v155_v24 = vsub.f32 0.0, %v147_v12 }
  0x3e   :  { %v201_v18 = vadd.f32 %v193_v13, %v137_v8  ;;  %v163_v25 = vmul.f32 0.75, %v91_v16 }
  0x3f   :  { %v256_v17 = vpop.eup %255  ;;  %v115_v29 = vmul.f32 %v107_v21, %v99_v20 }
  0x40   :  { %v129_v22 = vmul.f32 0.6931472, %v256_v17  ;;  %209 = vst [vmem:[#allocation7 + $0x28] sm:$0xff] %v201_v18  ;;  %v171_v33 = vmul.f32 %v163_v25, %v155_v24 }
  0x41   :  { %v258_v26 = vpop.eup %257 }
  0x42   :  { %v138_v27 = vmul.f32 %v129_v22, %v114_v19  ;;  %v185_v28 = vmul.f32 0.6931472, %v258_v26 }
  0x44   :  { %v260_v30 = vpop.eup %259  ;;  %v194_v31 = vmul.f32 %v185_v28, %v170_v23 }
  0x45   :  { %v131_v32 = vmul.f32 0.6931472, %v260_v30  ;;  %v262_v34 = vpop.eup %261 }
  0x46   :  { %v202_v35 = vadd.f32 %v194_v31, %v138_v27  ;;  %v187_v37 = vmul.f32 0.6931472, %v262_v34 }
  0x47   :  { %v139_v36 = vmul.f32 %v131_v32, %v115_v29 }
  0x48   :  { %210 = vst [vmem:[#allocation7 + $0x30] sm:$0xff] %v202_v35  ;;  %v195_v38 = vmul.f32 %v187_v37, %v171_v33 }
  0x4a   :  { %v203_v39 = vadd.f32 %v195_v38, %v139_v36 }
  0x4c   :  { %211 = vst [vmem:[#allocation7 + $0x38] sm:$0xff] %v203_v39 }
  0x4d   :  { %314 = shalt.err (!%p311_p0)
}
  0x4e   :  { %221 = dma.vmem_to_hbm [thread:$0]  %s219_s1, 1024, %s366_s2, [#allocation4]  }
  0x4f   :  { %327 = dma.done.wait [#allocation4], 1024  }
  0x50   :  { %328 = vsyncadd [#allocation4], 4294966272 }
  0x51   :  { %225 = vsyncpa [#allocation3], 1 }
  0x52   :  { %226 = vsyncpa [#allocation6], 1 }
  0x53   :  { %227 = vsyncpa [#allocation4], 1 }

</bundles_post_ra>
